<compile_context>
chip_gen: v7x
topology: tpu7x:2x2x1
jax: 0.10.0
libtpu: 0.0.40
codegen_flags: <defaults>
</compile_context>

<pallas_src>
import functools

import jax
import jax.numpy as jnp
from jax.experimental import pallas as pl
from jax.experimental.pallas import tpu as pltpu


def _round_up(x, m):
    return (x + m - 1) // m * m


def generate_random_filters(key, size, sparcity=0.5):
    """JAX port of generate_random_filters (deterministic via PRNG key)."""
    out_channels, in_channels, k, _ = size
    filters = jax.random.bernoulli(key, sparcity, size).astype(jnp.float32)
    filters = filters.at[:, :, k // 2, k // 2].set(0.0)
    fsum = filters.reshape(out_channels, in_channels, -1).sum(axis=2) + 1e-6
    filters = filters / fsum[:, :, None, None]
    filters = filters.at[:, :, k // 2, k // 2].set(-1.0)
    filters = filters * 0.5
    return filters


def _rf_conv_kernel(x_ref, w_ref, o_ref, *, K, WP, TL, TL_EXT, NB):
    # x_ref: (NB, C, LX)    flattened padded images of NB batch elements
    # w_ref: (OC, KK*C)     fused per-tap weights, VMEM-resident (constant map)
    # o_ref: (NB, OC, TL)   lane-dense output tile (TL % 128 == 0)
    base = pl.multiple_of(pl.program_id(1) * TL, 128)
    w = w_ref[...]                                     # (OC, KK*C)
    for nb in range(NB):                               # small static unroll
        # One aligned extended-slab load per (batch element, lane tile).
        slab = x_ref[nb, :, pl.ds(base, TL_EXT)]       # (C, TL_EXT)
        taps = []
        for kh in range(K):                            # static shifts of the
            for kw in range(K):                        # in-register slab
                s = kh * WP + kw
                taps.append(slab[:, s:s + TL])         # (C, TL)
        x_stack = jnp.concatenate(taps, axis=0)        # (KK*C, TL)
        # Single fused matmul over the KK*C contraction; f32 accumulation.
        o_ref[nb] = jnp.dot(
            w, x_stack, preferred_element_type=jnp.float32).astype(o_ref.dtype)


def random_filter_convolution(x, weight, padding=0, stride=1, *,
                              lane_tile=None, compute_dtype=None):
    """Forward pass of RandomFilterConvolution: conv2d, stride 1, no bias."""
    assert stride == 1, "the PyTorch module never forwards stride (always 1)"
    N, C, H, W = x.shape
    OC, IC, K, K2 = weight.shape
    assert IC == C and K == K2

    HP, WP = H + 2 * padding, W + 2 * padding
    OH, OW = HP - K + 1, WP - K + 1
    KK = K * K
    L = HP * WP                              # flattened padded-spatial length
    s_max = (K - 1) * WP + (K - 1)           # largest tap lane offset

    out_dtype = x.dtype
    if compute_dtype is not None:            # e.g. jnp.bfloat16 on v6e/v7x
        x = x.astype(compute_dtype)
        weight = weight.astype(compute_dtype)
    itemsize = jnp.dtype(x.dtype).itemsize
    out_itemsize = jnp.dtype(out_dtype).itemsize

    # Lane tile: multiple of 128 (unmasked stores), auto-scaled with OC / C so
    # the (OC, TL) result and the (KK*C, TL) stacked slab stay regalloc/VMEM
    # friendly across filter-count configurations.
    if lane_tile is None:
        if OC <= 16 and C <= 8:
            lane_tile = 2048
        elif OC <= 32 and C <= 16:
            lane_tile = 1024
        else:
            lane_tile = 512
    assert lane_tile % 128 == 0
    TL = min(_round_up(L, 128), lane_tile)
    T = pl.cdiv(L, TL)
    TL_EXT = _round_up(TL + s_max, 128)      # extended slab per tile (tap halo)
    LOP = T * TL                             # padded output lane length
    LX = (T - 1) * TL + TL_EXT               # padded input lane length

    # Batch elements per grid step: amortize the per-step pipeline overhead when
    # the whole image fits a single lane tile (the small-image case).
    if T == 1:
        per_elem = (C * LX + OC * TL) * itemsize
        NB = max(1, min(N, 8, (4 << 20) // max(per_elem, 1)))
    else:
        NB = 1
    NP = pl.cdiv(N, NB) * NB

    # Only the padded input lives in HBM (no K*K tap duplication).
    x_pad = jnp.pad(x, ((0, 0), (0, 0), (padding, padding), (padding, padding)))
    x_flat = x_pad.reshape(N, C, L)
    x_flat = jnp.pad(x_flat, ((0, NP - N), (0, 0), (0, LX - L)))

    # Fused weights: w_fused[oc, (kh*K + kw)*C + c] == weight[oc, c, kh, kw]
    # (matches the tap stacking order inside the kernel).
    w_fused = jnp.transpose(weight, (0, 2, 3, 1)).reshape(OC, KK * C)

    kernel = functools.partial(_rf_conv_kernel, K=K, WP=WP, TL=TL,
                               TL_EXT=TL_EXT, NB=NB)

    # Scoped-VMEM budget from the real (double-buffered) block footprint, so the
    # kernel neither hits v5e's 16 MiB default ceiling nor over-asks on v7x.
    in_block = NB * C * LX * itemsize
    w_block = OC * KK * C * itemsize
    out_block = NB * OC * TL * out_itemsize
    vmem_limit = min(max(2 * (in_block + w_block + out_block) + (4 << 20),
                         16 << 20), 64 << 20)
    # TODO(synk): for very large H*W (2*C*LX*itemsize beyond ~16 MiB, e.g.
    # 2048^2 images on v7x's 64 MiB VMEM) add a halo-tiled input path
    # (pl.Element index_map or manual make_async_copy from a pl.ANY ref) instead
    # of keeping the whole flattened image resident per batch element.

    cost = pl.CostEstimate(
        flops=2 * N * OC * C * KK * OH * OW,
        transcendentals=0,
        bytes_accessed=(NP * C * LX * itemsize + OC * KK * C * itemsize
                        + NP * OC * LOP * out_itemsize))

    out_flat = pl.pallas_call(
        kernel,
        out_shape=jax.ShapeDtypeStruct((NP, OC, LOP), out_dtype),
        grid_spec=pltpu.PrefetchScalarGridSpec(
            num_scalar_prefetch=0,
            grid=(NP // NB, T),
            in_specs=[
                # Whole padded image group per step; invariant over the t axis,
                # so it is DMA'd once per batch group.
                pl.BlockSpec((NB, C, LX), lambda n, t: (n, 0, 0)),
                # Tiny fused weights stay resident (constant block index).
                pl.BlockSpec((OC, KK * C), lambda n, t: (0, 0)),
            ],
            out_specs=pl.BlockSpec((NB, OC, TL), lambda n, t: (n, 0, t)),
        ),
        compiler_params=pltpu.CompilerParams(
            dimension_semantics=("parallel", "parallel"),
            vmem_limit_bytes=vmem_limit),
        cost_estimate=cost,
    )(x_flat, w_fused)

    # Drop batch/lane padding and crop to the valid output window.
    # TODO(synk): a downstream LBP loss could absorb this crop to save a pass.
    out = out_flat[:N, :, :L].reshape(N, OC, HP, WP)[:, :, :OH, :OW]
    return out


if __name__ == "__main__":
    key = jax.random.PRNGKey(0)
    kx, kw = jax.random.split(key)

    # Small shapes consistent with the module's forward.
    N, C, H, W = 2, 4, 16, 16
    OC, K, padding = 8, 3, 1

    x = jax.random.uniform(kx, (N, C, H, W), dtype=jnp.float32)
    weight = generate_random_filters(kw, (OC, C, K, K), sparcity=0.5)

    # f32 path: exact cross-check against XLA's conv (== nn.Conv2d, bias=False).
    y = jax.block_until_ready(
        random_filter_convolution(x, weight, padding=padding))

    y_ref = jax.lax.conv_general_dilated(
        x, weight, window_strides=(1, 1),
        padding=[(padding, padding), (padding, padding)],
        dimension_numbers=("NCHW", "OIHW", "NCHW"))
    assert y.shape == y_ref.shape == (N, OC, H + 2 * padding - K + 1,
                                      W + 2 * padding - K + 1)
    assert jnp.allclose(y, y_ref, atol=1e-4, rtol=1e-4)

    # bf16 compute path (f32 accumulation) — halves HBM bytes / doubles MXU
    # rate on v6e/v7x; checked with a looser tolerance.
    y_bf16 = jax.block_until_ready(
        random_filter_convolution(x, weight, padding=padding,
                                  compute_dtype=jnp.bfloat16))
    assert jnp.allclose(y_bf16, y_ref, atol=3e-2, rtol=3e-2)

    print("KERNEL_OK")
</pallas_src>

<mosaic_0001>
module attributes {stable_mosaic.version = 11 : i64} {
  func.func @_rf_conv_kernel(%arg0: i32, %arg1: i32, %arg2: memref<2x4x512xf32, #tpu.memory_space<vmem>>, %arg3: memref<8x36xf32, #tpu.memory_space<vmem>>, %arg4: memref<2x8x384xf32, #tpu.memory_space<vmem>>) attributes {dimension_semantics = [#tpu.dimension_semantics<parallel>, #tpu.dimension_semantics<parallel>], iteration_bounds = array<i64: 1, 1>, scalar_prefetch = 0 : i64, scratch_operands = 0 : i64, tpu.core_type = #tpu.core_type<tc>, window_params = [{transform_indices = @transform_0, window_bounds = array<i64: 2, 4, 512>}, {pipeline_mode = #tpu.pipeline_mode<synchronous>, transform_indices = @transform_1, window_bounds = array<i64: 8, 36>}, {transform_indices = @transform_2, window_bounds = array<i64: 2, 8, 384>}]} {
    %c384_i32 = arith.constant 384 : i32
    %0 = arith.muli %arg1, %c384_i32 : i32
    %1 = tpu.assume_multiple %0, 128 : i32
    %c0 = arith.constant 0 : index
    %c0_0 = arith.constant 0 : index
    %2 = vector.load %arg3[%c0, %c0_0] : memref<8x36xf32, #tpu.memory_space<vmem>>, vector<8x36xf32>
    %c0_1 = arith.constant 0 : index
    %c0_2 = arith.constant 0 : index
    %3 = arith.index_cast %1 : i32 to index
    %4 = vector.load %arg2[%c0_1, %c0_2, %3] : memref<2x4x512xf32, #tpu.memory_space<vmem>>, vector<1x4x512xf32>
    %5 = vector.shape_cast %4 : vector<1x4x512xf32> to vector<4x512xf32>
    %6 = vector.extract_strided_slice %5 {offsets = [0, 0], sizes = [4, 384], strides = [1, 1]} : vector<4x512xf32> to vector<4x384xf32>
    %7 = vector.extract_strided_slice %5 {offsets = [0, 1], sizes = [4, 384], strides = [1, 1]} : vector<4x512xf32> to vector<4x384xf32>
    %8 = vector.extract_strided_slice %5 {offsets = [0, 2], sizes = [4, 384], strides = [1, 1]} : vector<4x512xf32> to vector<4x384xf32>
    %9 = vector.extract_strided_slice %5 {offsets = [0, 18], sizes = [4, 384], strides = [1, 1]} : vector<4x512xf32> to vector<4x384xf32>
    %10 = vector.extract_strided_slice %5 {offsets = [0, 19], sizes = [4, 384], strides = [1, 1]} : vector<4x512xf32> to vector<4x384xf32>
    %11 = vector.extract_strided_slice %5 {offsets = [0, 20], sizes = [4, 384], strides = [1, 1]} : vector<4x512xf32> to vector<4x384xf32>
    %12 = vector.extract_strided_slice %5 {offsets = [0, 36], sizes = [4, 384], strides = [1, 1]} : vector<4x512xf32> to vector<4x384xf32>
    %13 = vector.extract_strided_slice %5 {offsets = [0, 37], sizes = [4, 384], strides = [1, 1]} : vector<4x512xf32> to vector<4x384xf32>
    %14 = vector.extract_strided_slice %5 {offsets = [0, 38], sizes = [4, 384], strides = [1, 1]} : vector<4x512xf32> to vector<4x384xf32>
    %15 = tpu.concatenate %6, %7, %8, %9, %10, %11, %12, %13, %14 in 0 : vector<4x384xf32>, vector<4x384xf32>, vector<4x384xf32>, vector<4x384xf32>, vector<4x384xf32>, vector<4x384xf32>, vector<4x384xf32>, vector<4x384xf32>, vector<4x384xf32> -> vector<36x384xf32>
    %cst = arith.constant dense<0.000000e+00> : vector<8x384xf32>
    %16 = tpu.matmul %2, %15, %cst {dimension_numbers = #tpu.dot_dimension_numbers<[1], [0], [0], [1], [0, 0, 1, 1], [], []>} : vector<8x36xf32>, vector<36x384xf32>, vector<8x384xf32> -> vector<8x384xf32>
    %c0_3 = arith.constant 0 : index
    %c0_4 = arith.constant 0 : index
    %c0_5 = arith.constant 0 : index
    %17 = vector.load %arg4[%c0_3, %c0_4, %c0_5] : memref<2x8x384xf32, #tpu.memory_space<vmem>>, vector<1x8x384xf32>
    %18 = vector.shape_cast %17 : vector<1x8x384xf32> to vector<8x384xf32>
    %19 = vector.shape_cast %16 : vector<8x384xf32> to vector<1x8x384xf32>
    tpu.vector_store %arg4[%c0_3, %c0_4, %c0_5], %19 {strides = array<i32>} : memref<2x8x384xf32, #tpu.memory_space<vmem>>, vector<1x8x384xf32>,
    %c1 = arith.constant 1 : index
    %c0_6 = arith.constant 0 : index
    %20 = arith.index_cast %1 : i32 to index
    %21 = vector.load %arg2[%c1, %c0_6, %20] : memref<2x4x512xf32, #tpu.memory_space<vmem>>, vector<1x4x512xf32>
    %22 = vector.shape_cast %21 : vector<1x4x512xf32> to vector<4x512xf32>
    %23 = vector.extract_strided_slice %22 {offsets = [0, 0], sizes = [4, 384], strides = [1, 1]} : vector<4x512xf32> to vector<4x384xf32>
    %24 = vector.extract_strided_slice %22 {offsets = [0, 1], sizes = [4, 384], strides = [1, 1]} : vector<4x512xf32> to vector<4x384xf32>
    %25 = vector.extract_strided_slice %22 {offsets = [0, 2], sizes = [4, 384], strides = [1, 1]} : vector<4x512xf32> to vector<4x384xf32>
    %26 = vector.extract_strided_slice %22 {offsets = [0, 18], sizes = [4, 384], strides = [1, 1]} : vector<4x512xf32> to vector<4x384xf32>
    %27 = vector.extract_strided_slice %22 {offsets = [0, 19], sizes = [4, 384], strides = [1, 1]} : vector<4x512xf32> to vector<4x384xf32>
    %28 = vector.extract_strided_slice %22 {offsets = [0, 20], sizes = [4, 384], strides = [1, 1]} : vector<4x512xf32> to vector<4x384xf32>
    %29 = vector.extract_strided_slice %22 {offsets = [0, 36], sizes = [4, 384], strides = [1, 1]} : vector<4x512xf32> to vector<4x384xf32>
    %30 = vector.extract_strided_slice %22 {offsets = [0, 37], sizes = [4, 384], strides = [1, 1]} : vector<4x512xf32> to vector<4x384xf32>
    %31 = vector.extract_strided_slice %22 {offsets = [0, 38], sizes = [4, 384], strides = [1, 1]} : vector<4x512xf32> to vector<4x384xf32>
    %32 = tpu.concatenate %23, %24, %25, %26, %27, %28, %29, %30, %31 in 0 : vector<4x384xf32>, vector<4x384xf32>, vector<4x384xf32>, vector<4x384xf32>, vector<4x384xf32>, vector<4x384xf32>, vector<4x384xf32>, vector<4x384xf32>, vector<4x384xf32> -> vector<36x384xf32>
    %cst_7 = arith.constant dense<0.000000e+00> : vector<8x384xf32>
    %33 = tpu.matmul %2, %32, %cst_7 {dimension_numbers = #tpu.dot_dimension_numbers<[1], [0], [0], [1], [0, 0, 1, 1], [], []>} : vector<8x36xf32>, vector<36x384xf32>, vector<8x384xf32> -> vector<8x384xf32>
    %c1_8 = arith.constant 1 : index
    %c0_9 = arith.constant 0 : index
    %c0_10 = arith.constant 0 : index
    %34 = vector.load %arg4[%c1_8, %c0_9, %c0_10] : memref<2x8x384xf32, #tpu.memory_space<vmem>>, vector<1x8x384xf32>
    %35 = vector.shape_cast %34 : vector<1x8x384xf32> to vector<8x384xf32>
    %36 = vector.shape_cast %33 : vector<8x384xf32> to vector<1x8x384xf32>
    tpu.vector_store %arg4[%c1_8, %c0_9, %c0_10], %36 {strides = array<i32>} : memref<2x8x384xf32, #tpu.memory_space<vmem>>, vector<1x8x384xf32>,
    return
  }
  func.func @transform_0(%arg0: i32, %arg1: i32) -> (i32, i32, i32) {
    %c0_i32 = arith.constant 0 : i32
    %c0_i32_0 = arith.constant 0 : i32
    %c0_i32_1 = arith.constant 0 : i32
    return %arg0, %c0_i32, %c0_i32_0 : i32, i32, i32
  }
  func.func @transform_1(%arg0: i32, %arg1: i32) -> (i32, i32) {
    %c0_i32 = arith.constant 0 : i32
    %c0_i32_0 = arith.constant 0 : i32
    %c0_i32_1 = arith.constant 0 : i32
    return %c0_i32, %c0_i32_0 : i32, i32
  }
  func.func @transform_2(%arg0: i32, %arg1: i32) -> (i32, i32, i32) {
    %c0_i32 = arith.constant 0 : i32
    %c0_i32_0 = arith.constant 0 : i32
    return %arg0, %c0_i32, %arg1 : i32, i32, i32
  }
}

</mosaic_0001>

<bundles_post_ra>
// kernel: tpu_custom_call.1
= control target key start
LH: loop header
LB: loop body
LE: loop exit
PB: predicated region body
PF: predicated region fallthrough
CT: control target
= control target key end

     0   :  { %7 = vsyncpa [#allocation3], 0  ;;  %s1205_s0 = inlined_call_operand.hbm [shape: f32[2,4,512], index: 0, kind: input, shape index: {}]   ;;  %s1206_s1 = inlined_call_operand.hbm [shape: f32[8,36], index: 1, kind: input, shape index: {}]   ;;  %s1207_s2 = inlined_call_operand.hbm [shape: f32[2,8,384], index: 2, kind: output, shape index: {}]  }
   0x1   :  { %8 = vsyncpa [#allocation6], 0 }
   0x2   :  { %9 = vsyncpa [#allocation4], 0  ;;  %s958_s9 = smov [#allocation2]   ;;  %s886_s13 = scalar_lea.hbm %s1205_s0, 512 }
   0x3   :  { %s15_s10 = sshll.u32 %s958_s9, 4  ;;  %p887_p0 = scmp.ne.s32.totalorder %s1205_s0, %s886_s13  ;;  %s16_s10 = int_to_ptr.vmem [resolvable:$true] %s15_s10 }
   0x4   :  { %p890_p1 = scmp.lt.u32.totalorder %s886_s13, %s1205_s0 }
   0x6   :  { %p892_p2 = pnand %p890_p1, %p887_p0 }
   0x8   :  { %895 = shalt.err (!%p892_p2)
}
   0x9   :  { %s896_s18 = scalar_lea.vmem %s16_s10, 512  ;;  %p901_p4 = scmp.lt.s32.totalorder %s16_s10, %s16_s10 }
   0xa   :  { %p897_p3 = scmp.ne.s32.totalorder %s16_s10, %s896_s18  ;;  %p902_p5 = scmp.lt.s32.totalorder %s896_s18, %s896_s18 }
   0xc   :  { %p903_p6 = por %p902_p5, %p901_p4 }
   0xe   :  { %p904_p7 = pnand %p903_p6, %p897_p3 }
  0x10   :  { %907 = shalt.err (!%p904_p7)
}
  0x11   :  { %s959_s19 = smov 256   ;;  %s960_s20 = smov 16  }
  0x12   :  { %21 = dma.hbm_to_vmem [thread:$0]  %s1205_s0, 512, %s16_s10, [#allocation3], %s959_s19, %s959_s19, %s960_s20  }
  0x13   :  { %s961_s23 = smov [#allocation5]   ;;  %s908_s27 = scalar_lea.hbm %s1206_s1, 128 }
  0x14   :  { %s28_s24 = sshll.u32 %s961_s23, 4  ;;  %p909_p8 = scmp.ne.s32.totalorder %s1206_s1, %s908_s27  ;;  %s29_s24 = int_to_ptr.vmem [resolvable:$true] %s28_s24 }
  0x15   :  { %p912_p9 = scmp.lt.u32.totalorder %s908_s27, %s1206_s1 }
  0x17   :  { %p914_p10 = pnand %p912_p9, %p909_p8 }
  0x19   :  { %917 = shalt.err (!%p914_p10)
}
  0x1a   :  { %s918_s4 = scalar_lea.vmem %s29_s24, 128  ;;  %p923_p12 = scmp.lt.s32.totalorder %s29_s24, %s29_s24 }
  0x1b   :  { %p919_p11 = scmp.ne.s32.totalorder %s29_s24, %s918_s4  ;;  %p924_p13 = scmp.lt.s32.totalorder %s918_s4, %s918_s4 }
  0x1d   :  { %p925_p0 = por %p924_p13, %p923_p12 }
  0x1f   :  { %p926_p1 = pnand %p925_p0, %p919_p11 }
  0x21   :  { %929 = shalt.err (!%p926_p1)
}
  0x22   :  { %31 = dma.hbm_to_vmem [thread:$0]  %s1206_s1, 128, %s29_s24, [#allocation6]  }
  0x23   :  { %952 = dma.done.wait [#allocation3], 512  }
  0x24   :  { %953 = vsyncadd [#allocation3], 4294966784 }
  0x25   :  { %954 = dma.done.wait [#allocation6], 128  }
  0x26   :  { %955 = vsyncadd [#allocation6], 4294967168  ;;  %v1015_v0 = vld [vmem:[#allocation2] sm:$0xff]  ;;  %v1017_v1 = vld [vmem:[#allocation2 + $0x8] sm:$0xff]  ;;  %s962_s1 = smov 110   ;;  %s963_s6 = smov 127  }
  0x27   :  { %v51_v2 = vcombine.low %v1017_v1, %v1017_v1  ;;  %v50_v3 = vcombine.low %v1015_v0, %v1015_v0  ;;  %v1025_v4 = vcombine.high %v1015_v0, %v1015_v0  ;;  %v67_v8 = vcombine.high %v1017_v1, %v1017_v1  ;;  %s964_s7 = smov 126   ;;  %s966_s8 = smov 108   ;;  %v1045_v11 = vld [vmem:[#allocation2 + $0x10] sm:$0xff]  ;;  %v1047_v12 = vld [vmem:[#allocation2 + $0x18] sm:$0xff] }
  0x28   :  { %v965_v10 = vmov 0.0|0.0   ;;  %s967_s9 = smov 109   ;;  %s968_s10 = smov 91   ;;  %v1051_v13 = vcombine.high %v1045_v11, %v1045_v11  ;;  %v347_v14 = vcombine.low %v1047_v12, %v1047_v12  ;;  %v346_v17 = vcombine.low %v1045_v11, %v1045_v11 }
  0x29   :  { %v748_v5 = vpack.i.bf16 %v51_v2, %v1015_v0  ;;  %v753_v6 = vpack.i.bf16 %v1017_v1, %v50_v3  ;;  %v743_v7 = vpack.i.bf16 %v1017_v1, %v1025_v4  ;;  %v758_v9 = vpack.i.bf16 %v67_v8, %v1015_v0  ;;  %700 = vmatprep.subr.bf16.mxu1 %v965_v10  ;;  %s969_s11 = smov 92   ;;  %s970_s12 = smov 90  }
  0x2a   :  { %v813_v15 = vpack.i.bf16 %v1047_v12, %v1051_v13  ;;  %v808_v16 = vpack.i.bf16 %v347_v14, %v1045_v11  ;;  %v823_v18 = vpack.i.bf16 %v1047_v12, %v346_v17  ;;  %v362_v19 = vcombine.high %v1047_v12, %v1047_v12  ;;  %s973_s13 = smov [#allocation7]  }
  0x2b   :  { %749 = vrot.lane.b32.xlu1 %v748_v5, %s962_s1  ;;  %739 = vrot.lane.b32.xlu0 %v748_v5, %s963_s6  ;;  %v971_v20 = vmov 0.0   ;;  %vm972_vm0 = vmmov 0   ;;  %vm60_vm1 = vcmask 1039360   ;;  %vm76_vm2 = vcmask 1031168   ;;  %s626_s14 = sshll.u32 %s973_s13, 4  ;;  %s627_s14 = int_to_ptr.vmem [resolvable:$true] %s626_s14 }
  0x2c   :  { %257 = vmatprep.mubr.f32.mxu0 %v971_v20  ;;  %676 = vmatprep.mubr.msk.f32.mxu1 %vm972_vm0, %v971_v20  ;;  %v828_v21 = vpack.i.bf16 %v362_v19, %v1045_v11  ;;  %vm91_vm3 = vcmask 900096   ;;  %vm170_vm4 = vcmask 1043456   ;;  %vm121_vm5 = vcmask 883712   ;;  %s930_s15 = scalar_lea.vmem %s627_s14, 768  ;;  %p935_p3 = scmp.lt.s32.totalorder %s627_s14, %s627_s14 }
  0x2d   :  { %vm106_vm6 = vcmask 891904   ;;  %vm151_vm7 = vcmask 744448   ;;  %vm136_vm8 = vcmask 752640   ;;  %vm166_vm9 = vcmask 736256   ;;  %p931_p2 = scmp.ne.s32.totalorder %s627_s14, %s930_s15  ;;  %p936_p4 = scmp.lt.s32.totalorder %s930_s15, %s930_s15 }
  0x2e   :  { %vm183_vm10 = vcmask 293888  }
  0x2f   :  { %754 = vrot.lane.b32.xlu1 %v753_v6, %s963_s6  ;;  %744 = vrot.lane.b32.xlu0 %v743_v7, %s964_s7  ;;  %p937_p5 = por %p936_p4, %p935_p3 }
  0x31   :  { %p938_p6 = pnand %p937_p5, %p931_p2 }
  0x33   :  { %764 = vrot.lane.b32.xlu1 %v753_v6, %s962_s1  ;;  %759 = vrot.lane.b32.xlu0 %v758_v9, %s964_s7 }
  0x37   :  { %774 = vrot.lane.b32.xlu1 %v748_v5, %s966_s8  ;;  %769 = vrot.lane.b32.xlu0 %v743_v7, %s967_s9 }
  0x3b   :  { %784 = vrot.lane.b32.xlu1 %v748_v5, %s968_s10  ;;  %779 = vrot.lane.b32.xlu0 %v743_v7, %s969_s11 }
  0x3f   :  { %794 = vrot.lane.b32.xlu1 %v753_v6, %s966_s8  ;;  %789 = vrot.lane.b32.xlu0 %v758_v9, %s967_s9 }
  0x43   :  { %804 = vrot.lane.b32.xlu1 %v753_v6, %s968_s10  ;;  %799 = vrot.lane.b32.xlu0 %v758_v9, %s969_s11 }
  0x47   :  { %814 = vrot.lane.b32.xlu1 %v813_v15, %s964_s7  ;;  %809 = vrot.lane.b32.xlu0 %v808_v16, %s963_s6 }
  0x4b   :  { %160 = vrot.lane.b32.xlu1 %v1025_v4, %s970_s12  ;;  %819 = vrot.lane.b32.xlu0 %v808_v16, %s962_s1 }
  0x4f   :  { %824 = vrot.lane.b32.xlu1 %v823_v18, %s963_s6  ;;  %162 = vrot.lane.b32.xlu0 %v1017_v1, %s970_s12 }
  0x53   :  { %834 = vrot.lane.b32.xlu1 %v823_v18, %s962_s1  ;;  %829 = vrot.lane.b32.xlu0 %v828_v21, %s964_s7 }
  0x57   :  { %164 = vrot.lane.b32.xlu1 %v67_v8, %s970_s12  ;;  %158 = vrot.lane.b32.xlu0 %v1015_v0, %s970_s12 }
  0x5b   :  { %844 = vrot.lane.b32.xlu1 %v808_v16, %s966_s8  ;;  %839 = vrot.lane.b32.xlu0 %v813_v15, %s967_s9 }
  0x5f   :  { %854 = vrot.lane.b32.xlu1 %v808_v16, %s968_s10  ;;  %849 = vrot.lane.b32.xlu0 %v813_v15, %s969_s11 }
  0x63   :  { %864 = vrot.lane.b32.xlu1 %v823_v18, %s966_s8  ;;  %859 = vrot.lane.b32.xlu0 %v828_v21, %s967_s9 }
  0x67   :  { %874 = vrot.lane.b32.xlu1 %v823_v18, %s968_s10  ;;  %869 = vrot.lane.b32.xlu0 %v828_v21, %s969_s11 }
  0x6b   :  { %451 = vrot.lane.b32.xlu1 %v1047_v12, %s970_s12  ;;  %449 = vrot.lane.b32.xlu0 %v1051_v13, %s970_s12 }
  0x6f   :  { %453 = vrot.lane.b32.xlu1 %v362_v19, %s970_s12  ;;  %447 = vrot.lane.b32.xlu0 %v1045_v11, %s970_s12 }
  0x9d   :  { %v750_v22 = vpop.permute.xlu1 %749  ;;  %v740_v23 = vpop.permute.xlu0 %739 }
  0x9e   :  { %v742_v24 = vunpack.i.h.bf16 %v740_v23  ;;  %v741_v25 = vunpack.i.l.bf16 %v740_v23  ;;  %v752_v26 = vunpack.i.h.bf16 %v750_v22  ;;  %v751_v27 = vunpack.i.l.bf16 %v750_v22 }
  0xa0   :  { %v62_v32 = vsel %vm60_vm1, %v741_v25, %v742_v24  ;;  %v93_v36 = vsel %vm91_vm3, %v751_v27, %v752_v26 }
  0xa1   :  { %v755_v28 = vpop.permute.xlu1 %754  ;;  %v745_v29 = vpop.permute.xlu0 %744  ;;  %v172_v39 = vsel %vm170_vm4, %v1025_v4, %v62_v32 }
  0xa2   :  { %v747_v30 = vunpack.i.h.bf16 %v745_v29  ;;  %v746_v31 = vunpack.i.l.bf16 %v745_v29  ;;  %v757_v33 = vunpack.i.h.bf16 %v755_v28  ;;  %v756_v34 = vunpack.i.l.bf16 %v755_v28 }
  0xa4   :  { %v78_v35 = vsel %vm76_vm2, %v746_v31, %v747_v30  ;;  %v61_v46 = vsel %vm60_vm1, %v756_v34, %v741_v25  ;;  %v63_v47 = vsel %vm60_vm1, %v742_v24, %v757_v33 }
  0xa5   :  { %v765_v37 = vpop.permute.xlu1 %764  ;;  %v760_v38 = vpop.permute.xlu0 %759  ;;  %v175_v40 = vsel %vm170_vm4, %v78_v35, %v93_v36  ;;  %v171_v58 = vsel %vm170_vm4, %v1015_v0, %v61_v46  ;;  %v173_v59 = vsel %vm170_vm4, %v1017_v1, %v63_v47 }
  0xa6   :  { %v767_v41 = vunpack.i.h.bf16 %v765_v37  ;;  %v766_v42 = vunpack.i.l.bf16 %v765_v37  ;;  %v762_v43 = vunpack.i.h.bf16 %v760_v38  ;;  %v761_v44 = vunpack.i.l.bf16 %v760_v38 }
  0xa7   :  { %v692_v45 = vpack.c.bf16 %v175_v40, %v172_v39 }
  0xa8   :  { %v77_v48 = vsel %vm76_vm2, %v761_v44, %v746_v31  ;;  %v92_v49 = vsel %vm91_vm3, %v766_v42, %v751_v27  ;;  %v79_v50 = vsel %vm76_vm2, %v747_v30, %v762_v43  ;;  %v94_v51 = vsel %vm91_vm3, %v752_v26, %v767_v41 }
  0xa9   :  { %693 = vmatprep.subr.bf16.mxu0 %v692_v45  ;;  %v775_v52 = vpop.permute.xlu1 %774  ;;  %v770_v53 = vpop.permute.xlu0 %769  ;;  %v174_v54 = vsel %vm170_vm4, %v77_v48, %v92_v49  ;;  %v176_v55 = vsel %vm170_vm4, %v79_v50, %v94_v51 }
  0xaa   :  { %v777_v56 = vunpack.i.h.bf16 %v775_v52  ;;  %v776_v57 = vunpack.i.l.bf16 %v775_v52  ;;  %v772_v60 = vunpack.i.h.bf16 %v770_v53  ;;  %v771_v61 = vunpack.i.l.bf16 %v770_v53 }
  0xab   :  { %v694_v62 = vpack.c.bf16 %v174_v54, %v171_v58  ;;  %v701_v63 = vpack.c.bf16 %v176_v55, %v173_v59 }
  0xac   :  { %v123_v0 = vsel %vm121_vm5, %v776_v57, %v777_v56  ;;  %v108_v1 = vsel %vm106_vm6, %v771_v61, %v772_v60 }
  0xad   :  { %695 = vmatpush1.bf16.msra.mxu0 %v694_v62  ;;  %702 = vmatpush3.bf16.msra.mxu1 %v701_v63  ;;  %v785_v2 = vpop.permute.xlu1 %784  ;;  %v780_v3 = vpop.permute.xlu0 %779  ;;  %v178_v18 = vsel %vm170_vm4, %v108_v1, %v123_v0 }
  0xae   :  { %v787_v4 = vunpack.i.h.bf16 %v785_v2  ;;  %v786_v5 = vunpack.i.l.bf16 %v785_v2  ;;  %v782_v6 = vunpack.i.h.bf16 %v780_v3  ;;  %v781_v7 = vunpack.i.l.bf16 %v780_v3  ;;  %703 = vmatprep.subr.bf16.mxu1 %v965_v10 }
  0xb0   :  { %v153_v8 = vsel %vm151_vm7, %v786_v5, %v787_v4  ;;  %v138_v9 = vsel %vm136_vm8, %v781_v7, %v782_v6 }
  0xb1   :  { %v795_v14 = vpop.permute.xlu1 %794  ;;  %v790_v15 = vpop.permute.xlu0 %789  ;;  %v181_v16 = vsel %vm170_vm4, %v138_v9, %v153_v8 }
  0xb2   :  { %v797_v17 = vunpack.i.h.bf16 %v795_v14  ;;  %v796_v19 = vunpack.i.l.bf16 %v795_v14  ;;  %v792_v21 = vunpack.i.h.bf16 %v790_v15  ;;  %v791_v22 = vunpack.i.l.bf16 %v790_v15 }
  0xb3   :  { %v696_v23 = vpack.c.bf16 %v181_v16, %v178_v18 }
  0xb4   :  { %v122_v30 = vsel %vm121_vm5, %v796_v19, %v776_v57  ;;  %v124_v31 = vsel %vm121_vm5, %v777_v56, %v797_v17  ;;  %v107_v32 = vsel %vm106_vm6, %v791_v22, %v771_v61  ;;  %v109_v33 = vsel %vm106_vm6, %v772_v60, %v792_v21 }
  0xb5   :  { %697 = vmatprep.subr.bf16.mxu0 %v696_v23  ;;  %v805_v24 = vpop.permute.xlu1 %804  ;;  %v800_v25 = vpop.permute.xlu0 %799  ;;  %v177_v42 = vsel %vm170_vm4, %v107_v32, %v122_v30  ;;  %v179_v43 = vsel %vm170_vm4, %v109_v33, %v124_v31 }
  0xb6   :  { %v807_v26 = vunpack.i.h.bf16 %v805_v24  ;;  %v806_v27 = vunpack.i.l.bf16 %v805_v24  ;;  %v802_v28 = vunpack.i.h.bf16 %v800_v25  ;;  %v801_v29 = vunpack.i.l.bf16 %v800_v25  ;;  %v1151_v25 = vld [vmem:[#allocation5] sm:$0xff] }
  0xb8   :  { %v152_v34 = vsel %vm151_vm7, %v806_v27, %v786_v5  ;;  %v154_v35 = vsel %vm151_vm7, %v787_v4, %v807_v26  ;;  %v137_v36 = vsel %vm136_vm8, %v801_v29, %v781_v7  ;;  %v139_v37 = vsel %vm136_vm8, %v782_v6, %v802_v28 }
  0xb9   :  { %v815_v38 = vpop.permute.xlu1 %814  ;;  %v810_v39 = vpop.permute.xlu0 %809  ;;  %v180_v40 = vsel %vm170_vm4, %v137_v36, %v152_v34  ;;  %v182_v41 = vsel %vm170_vm4, %v139_v37, %v154_v35 }
  0xba   :  { %v698_v44 = vpack.c.bf16 %v180_v40, %v177_v42  ;;  %v704_v45 = vpack.c.bf16 %v182_v41, %v179_v43  ;;  %v812_v48 = vunpack.i.h.bf16 %v810_v39  ;;  %v811_v49 = vunpack.i.l.bf16 %v810_v39 }
  0xbb   :  { %v817_v52 = vunpack.i.h.bf16 %v815_v38  ;;  %v816_v53 = vunpack.i.l.bf16 %v815_v38 }
  0xbc   :  { %699 = vmatpush1.bf16.msra.mxu0 %v698_v44  ;;  %705 = vmatpush3.bf16.msra.mxu1 %v704_v45  ;;  %v357_v57 = vsel %vm60_vm1, %v811_v49, %v812_v48 }
  0xbd   :  { %v161_v46 = vpop.permute.xlu1 %160  ;;  %v820_v47 = vpop.permute.xlu0 %819  ;;  %674 = vmatprep.subr.mxu1 %v971_v20  ;;  %v372_v61 = vsel %vm76_vm2, %v816_v53, %v817_v52  ;;  %v459_v5 = vsel %vm170_vm4, %v1051_v13, %v357_v57 }
  0xbe   :  { %v822_v50 = vunpack.i.h.bf16 %v820_v47  ;;  %v821_v51 = vunpack.i.l.bf16 %v820_v47 }
  0xc0   :  { %v386_v54 = vsel %vm91_vm3, %v821_v51, %v822_v50 }
  0xc1   :  { %v825_v55 = vpop.permute.xlu1 %824  ;;  %v163_v56 = vpop.permute.xlu0 %162  ;;  %v462_v62 = vsel %vm170_vm4, %v372_v61, %v386_v54 }
  0xc2   :  { %v827_v58 = vunpack.i.h.bf16 %v825_v55  ;;  %v826_v59 = vunpack.i.l.bf16 %v825_v55  ;;  %v168_v60 = vsel %vm166_vm9, %v161_v46, %v163_v56  ;;  %v706_v8 = vpack.c.bf16 %v462_v62, %v459_v5 }
  0xc3   :  { %644 = vmatprep.subr.msk.mxu0 %vm170_vm4, %v168_v60 }
  0xc4   :  { %v356_v63 = vsel %vm60_vm1, %v826_v59, %v811_v49  ;;  %v358_v2 = vsel %vm60_vm1, %v812_v48, %v827_v58 }
  0xc5   :  { %v835_v3 = vpop.permute.xlu1 %834  ;;  %v830_v4 = vpop.permute.xlu0 %829  ;;  %v458_v19 = vsel %vm170_vm4, %v1045_v11, %v356_v63  ;;  %v460_v21 = vsel %vm170_vm4, %v1047_v12, %v358_v2 }
  0xc6   :  { %v837_v6 = vunpack.i.h.bf16 %v835_v3  ;;  %v836_v7 = vunpack.i.l.bf16 %v835_v3  ;;  %v832_v0 = vunpack.i.h.bf16 %v830_v4  ;;  %v831_v1 = vunpack.i.l.bf16 %v830_v4 }
  0xc8   :  { %v385_v9 = vsel %vm91_vm3, %v836_v7, %v821_v51  ;;  %v387_v14 = vsel %vm91_vm3, %v822_v50, %v837_v6  ;;  %v373_v15 = vsel %vm76_vm2, %v817_v52, %v832_v0  ;;  %v371_v16 = vsel %vm76_vm2, %v831_v1, %v816_v53 }
  0xc9   :  { %v165_v17 = vpop.permute.xlu1 %164  ;;  %v159_v18 = vpop.permute.xlu0 %158  ;;  %v461_v13 = vsel %vm170_vm4, %v371_v16, %v385_v9  ;;  %v463_v22 = vsel %vm170_vm4, %v373_v15, %v387_v14 }
  0xca   :  { %v169_v23 = vsel %vm166_vm9, %v163_v56, %v165_v17  ;;  %v167_v24 = vsel %vm166_vm9, %v159_v18, %v161_v46  ;;  %v708_v26 = vpack.c.bf16 %v461_v13, %v458_v19  ;;  %v715_v27 = vpack.c.bf16 %v463_v22, %v460_v21 }
  0xcb   :  { %645 = vmatpush1.msk.msra.mxu0 %vm170_vm4, %v167_v24  ;;  %675 = vmatpush3.msk.msra.mxu1 %vm170_vm4, %v169_v23 }
  0xcc   :  { %707 = vmatprep.subr.bf16.mxu0 %v706_v8  ;;  %714 = vmatprep.subr.bf16.mxu1 %v965_v10 }
  0xcd   :  { %v845_v11 = vpop.permute.xlu1 %844  ;;  %v840_v28 = vpop.permute.xlu0 %839  ;;  %646 = vmatmul.mubr.msk.f32.vlgmr.msra.gmra.mrb[0].mxu0 %vm183_vm10, %v1151_v25  ;;  %677 = vmatmul.mubr.msk.f32.vlgmr.msra.gmra.mrb[0].mxu1 %vm183_vm10, %v1151_v25 }
  0xce   :  { %v847_v12 = vunpack.i.h.bf16 %v845_v11  ;;  %v846_v29 = vunpack.i.l.bf16 %v845_v11  ;;  %v842_v30 = vunpack.i.h.bf16 %v840_v28  ;;  %v841_v31 = vunpack.i.l.bf16 %v840_v28  ;;  %709 = vmatpush1.bf16.msra.mxu0 %v708_v26  ;;  %716 = vmatpush3.bf16.msra.mxu1 %v715_v27 }
  0xcf   :  { %717 = vmatprep.subr.bf16.mxu1 %v965_v10  ;;  %540 = vmatprep.mubr.f32.mxu0 %v971_v20 }
  0xd0   :  { %689 = vmatprep.mubr.msk.f32.mxu1 %vm972_vm0, %v971_v20  ;;  %v414_v32 = vsel %vm121_vm5, %v846_v29, %v847_v12  ;;  %v400_v33 = vsel %vm106_vm6, %v841_v31, %v842_v30 }
  0xd1   :  { %v855_v34 = vpop.permute.xlu1 %854  ;;  %v850_v35 = vpop.permute.xlu0 %849  ;;  %v465_v43 = vsel %vm170_vm4, %v400_v33, %v414_v32 }
  0xd2   :  { %v857_v36 = vunpack.i.h.bf16 %v855_v34  ;;  %v856_v37 = vunpack.i.l.bf16 %v855_v34  ;;  %v852_v38 = vunpack.i.h.bf16 %v850_v35  ;;  %v851_v39 = vunpack.i.l.bf16 %v850_v35 }
  0xd4   :  { %v442_v40 = vsel %vm151_vm7, %v856_v37, %v857_v36  ;;  %v428_v41 = vsel %vm136_vm8, %v851_v39, %v852_v38 }
  0xd5   :  { %v865_v10 = vpop.permute.xlu1 %864  ;;  %v860_v42 = vpop.permute.xlu0 %859  ;;  %v468_v44 = vsel %vm170_vm4, %v428_v41, %v442_v40 }
  0xd6   :  { %v867_v45 = vunpack.i.h.bf16 %v865_v10  ;;  %v866_v46 = vunpack.i.l.bf16 %v865_v10  ;;  %v862_v47 = vunpack.i.h.bf16 %v860_v42  ;;  %v861_v48 = vunpack.i.l.bf16 %v860_v42 }
  0xd7   :  { %v710_v49 = vpack.c.bf16 %v468_v44, %v465_v43 }
  0xd8   :  { %v413_v50 = vsel %vm121_vm5, %v866_v46, %v846_v29  ;;  %v415_v51 = vsel %vm121_vm5, %v847_v12, %v867_v45  ;;  %v399_v52 = vsel %vm106_vm6, %v861_v48, %v841_v31  ;;  %v401_v53 = vsel %vm106_vm6, %v842_v30, %v862_v47 }
  0xd9   :  { %711 = vmatprep.subr.bf16.mxu0 %v710_v49  ;;  %v875_v54 = vpop.permute.xlu1 %874  ;;  %v870_v55 = vpop.permute.xlu0 %869  ;;  %v464_v4 = vsel %vm170_vm4, %v399_v52, %v413_v50  ;;  %v466_v6 = vsel %vm170_vm4, %v401_v53, %v415_v51 }
  0xda   :  { %v877_v56 = vunpack.i.h.bf16 %v875_v54  ;;  %v876_v57 = vunpack.i.l.bf16 %v875_v54  ;;  %v872_v58 = vunpack.i.h.bf16 %v870_v55  ;;  %v871_v59 = vunpack.i.l.bf16 %v870_v55 }
  0xdc   :  { %v441_v60 = vsel %vm151_vm7, %v876_v57, %v856_v37  ;;  %v443_v61 = vsel %vm151_vm7, %v857_v36, %v877_v56  ;;  %v427_v62 = vsel %vm136_vm8, %v871_v59, %v851_v39  ;;  %v429_v63 = vsel %vm136_vm8, %v852_v38, %v872_v58 }
  0xdd   :  { %v452_v2 = vpop.permute.xlu1 %451  ;;  %v450_v3 = vpop.permute.xlu0 %449  ;;  %v467_v5 = vsel %vm170_vm4, %v427_v62, %v441_v60  ;;  %v469_v7 = vsel %vm170_vm4, %v429_v63, %v443_v61 }
  0xde   :  { %v456_v0 = vsel %vm166_vm9, %v450_v3, %v452_v2  ;;  %v712_v1 = vpack.c.bf16 %v467_v5, %v464_v4  ;;  %v718_v8 = vpack.c.bf16 %v469_v7, %v466_v6 }
  0xe0   :  { %713 = vmatpush1.bf16.msra.mxu0 %v712_v1  ;;  %719 = vmatpush3.bf16.msra.mxu1 %v718_v8 }
  0xe1   :  { %v454_v9 = vpop.permute.xlu1 %453  ;;  %v448_v14 = vpop.permute.xlu0 %447  ;;  %649 = vmatprep.subr.msk.mxu0 %vm170_vm4, %v456_v0  ;;  %687 = vmatprep.subr.mxu1 %v971_v20 }
  0xe2   :  { %v457_v15 = vsel %vm166_vm9, %v452_v2, %v454_v9  ;;  %v455_v16 = vsel %vm166_vm9, %v448_v14, %v450_v3 }
  0xe4   :  { %650 = vmatpush1.msk.msra.mxu0 %vm170_vm4, %v455_v16  ;;  %688 = vmatpush3.msk.msra.mxu1 %vm170_vm4, %v457_v15 }
  0xe5   :  { %651 = vmatmul.mubr.msk.f32.vlgmr.msra.gmra.mrb[2].mxu0 %vm183_vm10, %v1151_v25  ;;  %690 = vmatmul.mubr.msk.f32.vlgmr.msra.gmra.mrb[2].mxu1 %vm183_vm10, %v1151_v25 }
 0x1a0   :  { %v259_v17 = vpop.f32.mrb[0].mxu0  ;;  %v330_v18 = vpop.f32.mrb[0].mxu1 }
 0x1a1   :  { %334 = vst [vmem:[#allocation7] sm:$0xff] %v259_v17  ;;  %v261_v19 = vpop.f32.mrb[1].mxu0  ;;  %336 = vst [vmem:[#allocation7 + $0x10] sm:$0xff] %v330_v18  ;;  %v678_v20 = vpop.f32.mrb[1].mxu1 }
 0x1a2   :  { %335 = vst [vmem:[#allocation7 + $0x8] sm:$0xff] %v261_v19 }
 0x1b8   :  { %v542_v13 = vpop.f32.mrb[2].mxu0  ;;  %v613_v21 = vpop.f32.mrb[2].mxu1 }
 0x1b9   :  { %618 = vst [vmem:[#allocation7 + $0x18] sm:$0xff] %v542_v13  ;;  %620 = vst [vmem:[#allocation7 + $0x28] sm:$0xff] %v613_v21  ;;  %v544_v22 = vpop.f32.mrb[3].mxu0  ;;  %v691_v23 = vpop.f32.mrb[3].mxu1 }
 0x1ba   :  { %619 = vst [vmem:[#allocation7 + $0x20] sm:$0xff] %v544_v22 }
 0x1bb   :  { %941 = shalt.err (!%p938_p6)
}
 0x1bc   :  { %s942_s18 = scalar_lea.hbm %s1207_s2, 768 }
 0x1bd   :  { %p943_p7 = scmp.ne.s32.totalorder %s1207_s2, %s942_s18  ;;  %p946_p8 = scmp.lt.u32.totalorder %s942_s18, %s1207_s2 }
 0x1bf   :  { %p948_p9 = pnand %p946_p8, %p943_p7 }
 0x1c1   :  { %951 = shalt.err (!%p948_p9)
}
 0x1c2   :  { %s974_s23 = smov 384   ;;  %s975_s24 = smov 24  }
 0x1c3   :  { %632 = dma.vmem_to_hbm [thread:$0]  %s627_s14, 768, %s1207_s2, [#allocation4], %s974_s23, %s974_s23, %s975_s24  }
 0x1c4   :  { %956 = dma.done.wait [#allocation4], 768  }
 0x1c5   :  { %957 = vsyncadd [#allocation4], 4294966528 }
 0x1c6   :  { %636 = vsyncpa [#allocation3], 1 }
 0x1c7   :  { %637 = vsyncpa [#allocation6], 1 }
 0x1c8   :  { %638 = vsyncpa [#allocation4], 1 }

</bundles_post_ra>
